<compile_context>
chip_gen: v6e
topology: v6e:2x2x1
jax: 0.10.0
libtpu: 0.0.40
codegen_flags: <defaults>
</compile_context>

<pallas_src>
import jax
import jax.numpy as jnp
from jax.experimental import pallas as pl
from jax.experimental.pallas import tpu as pltpu
import numpy as np


def se_kernel(x_ref, pool_ref, w1t_ref, w2t_ref, expand_ref, o_ref):
    # x_ref      : (B_tile, C*L)   lane-dense input block
    # pool_ref   : (C*L, C)        per-channel mean-pool matrix (1/L folded in)
    # w1t_ref    : (C, H)          fc1 weight, transposed to row-major use
    # w2t_ref    : (H, C)          fc2 weight, transposed to row-major use
    # expand_ref : (C, C*L)        broadcast-over-L matrix
    # o_ref      : (B_tile, C*L)   lane-dense output block
    x = x_ref[...]                                   # (Bt, C*L), native dtype
    xf = x.astype(jnp.float32)

    # Squeeze: per-channel mean over L as a lane-dense MXU contraction.
    y = jnp.dot(xf, pool_ref[...],
                preferred_element_type=jnp.float32)                   # (Bt, C)

    # Excite: two bias-free linears (batched, C kept on lanes) + ReLU/sigmoid.
    h = jnp.maximum(
        jnp.dot(y, w1t_ref[...], preferred_element_type=jnp.float32), 0.0)  # (Bt, H)
    s = jax.nn.sigmoid(
        jnp.dot(h, w2t_ref[...], preferred_element_type=jnp.float32))       # (Bt, C)

    # Broadcast the per-channel gate over L while staying lane-dense.
    scale = jnp.dot(s, expand_ref[...],
                    preferred_element_type=jnp.float32)               # (Bt, C*L)

    # Fused rescale + store (lane-dense).  Multiply in the input dtype: f32
    # here; for bf16 inputs this is the v6e/v7x-preferred bf16 VPU path.
    # (On v5e with bf16 inputs, cast to f32 before the multiply instead.)
    o_ref[...] = (x * scale.astype(x.dtype)).astype(o_ref.dtype)


def _pick_batch_tile(n, row_bytes, target_bytes=1 << 20):
    """Largest divisor of n whose block stays under ~target_bytes, while keeping
    at least 2 grid steps (both v7x TensorCores busy) whenever n > 1."""
    best = 1
    for bt in range(1, n + 1):
        if n % bt:
            continue
        if bt * row_bytes > target_bytes:
            break
        if n == 1 or n // bt >= 2:
            best = bt
    return best


def squeeze_excite(x, w1, w2, *, batch_tile=None):
    """x: (N, C, L);  w1: (H, C);  w2: (C, H)  (PyTorch Linear weight layout)."""
    N, C, L = x.shape
    H = w1.shape[0]
    CL = C * L

    if batch_tile is None:
        batch_tile = _pick_batch_tile(N, CL * x.dtype.itemsize)
    assert N % batch_tile == 0, "batch_tile must divide N"
    grid = (N // batch_tile,)

    # Lane-dense view of x / out: trailing dim is C*L (contiguous reshape).
    x2 = x.reshape(N, CL)
    # Row-major weights for batched (B, C) @ (C, H) / (B, H) @ (H, C).
    w1t = w1.T.astype(jnp.float32)                  # (C, H)
    w2t = w2.T.astype(jnp.float32)                  # (H, C)
    # Constant pool / expand matrices (built once, outside the kernel).
    eye = jnp.eye(C, dtype=jnp.float32)
    expand = jnp.repeat(eye, L, axis=1)             # (C, C*L): expand[c, c*L+l] = 1
    pool = expand.T * (1.0 / L)                     # (C*L, C): mean-pool, 1/L folded in

    out2 = pl.pallas_call(
        se_kernel,
        out_shape=jax.ShapeDtypeStruct((N, CL), x.dtype),
        grid=grid,
        in_specs=[
            pl.BlockSpec((batch_tile, CL), lambda b: (b, 0)),   # x tile (lane-dense)
            pl.BlockSpec((CL, C), lambda b: (0, 0)),            # pool matrix (resident)
            pl.BlockSpec((C, H), lambda b: (0, 0)),             # fc1 weight^T
            pl.BlockSpec((H, C), lambda b: (0, 0)),             # fc2 weight^T
            pl.BlockSpec((C, CL), lambda b: (0, 0)),            # expand matrix
        ],
        out_specs=pl.BlockSpec((batch_tile, CL), lambda b: (b, 0)),
        compiler_params=pltpu.CompilerParams(
            dimension_semantics=("parallel",)),
    )(x2, pool, w1t, w2t, expand)

    return out2.reshape(N, C, L)


def squeeze_excite_ref(x, w1, w2):
    # Pure-JAX reference mirroring the PyTorch forward (batch > 1 assumed,
    # matching torch's .squeeze() semantics there).
    y = jnp.mean(x, axis=2)                     # (N, C)  == gap(x).squeeze()
    y = jnp.maximum(y @ w1.T, 0.0)              # (N, H)
    y = jax.nn.sigmoid(y @ w2.T)                # (N, C)
    return x * y[:, :, None]                    # broadcast over L


if __name__ == "__main__":
    # Small shapes consistent with the module: ni=64, reduction=16 -> hidden=4.
    N, C, L = 16, 64, 16
    reduction = 16
    H = C // reduction

    key = jax.random.PRNGKey(0)
    kx, k1, k2 = jax.random.split(key, 3)
    x = jax.random.normal(kx, (N, C, L), dtype=jnp.float32)
    # PyTorch Linear layout: (out_features, in_features).
    bound1 = 1.0 / np.sqrt(C)
    bound2 = 1.0 / np.sqrt(H)
    w1 = jax.random.uniform(k1, (H, C), minval=-bound1, maxval=bound1,
                            dtype=jnp.float32)
    w2 = jax.random.uniform(k2, (C, H), minval=-bound2, maxval=bound2,
                            dtype=jnp.float32)

    out = squeeze_excite(x, w1, w2)
    out = jax.block_until_ready(out)

    ref = squeeze_excite_ref(x, w1, w2)
    np.testing.assert_allclose(np.asarray(out), np.asarray(ref),
                               rtol=1e-5, atol=1e-5)
    print("KERNEL_OK")
</pallas_src>

<mosaic_0001>
module attributes {stable_mosaic.version = 11 : i64} {
  func.func @se_kernel(%arg0: i32, %arg1: memref<8x1024xf32, #tpu.memory_space<vmem>>, %arg2: memref<1024x64xf32, #tpu.memory_space<vmem>>, %arg3: memref<64x4xf32, #tpu.memory_space<vmem>>, %arg4: memref<4x64xf32, #tpu.memory_space<vmem>>, %arg5: memref<64x1024xf32, #tpu.memory_space<vmem>>, %arg6: memref<8x1024xf32, #tpu.memory_space<vmem>>) attributes {dimension_semantics = [#tpu.dimension_semantics<parallel>], iteration_bounds = array<i64: 2>, scalar_prefetch = 0 : i64, scratch_operands = 0 : i64, tpu.core_type = #tpu.core_type<tc>, window_params = [{transform_indices = @transform_0, window_bounds = array<i64: 8, 1024>}, {pipeline_mode = #tpu.pipeline_mode<synchronous>, transform_indices = @transform_1, window_bounds = array<i64: 1024, 64>}, {pipeline_mode = #tpu.pipeline_mode<synchronous>, transform_indices = @transform_2, window_bounds = array<i64: 64, 4>}, {pipeline_mode = #tpu.pipeline_mode<synchronous>, transform_indices = @transform_3, window_bounds = array<i64: 4, 64>}, {pipeline_mode = #tpu.pipeline_mode<synchronous>, transform_indices = @transform_4, window_bounds = array<i64: 64, 1024>}, {transform_indices = @transform_5, window_bounds = array<i64: 8, 1024>}]} {
    %c0 = arith.constant 0 : index
    %c0_0 = arith.constant 0 : index
    %0 = vector.load %arg1[%c0, %c0_0] : memref<8x1024xf32, #tpu.memory_space<vmem>>, vector<8x1024xf32>
    %c0_1 = arith.constant 0 : index
    %c0_2 = arith.constant 0 : index
    %1 = vector.load %arg2[%c0_1, %c0_2] : memref<1024x64xf32, #tpu.memory_space<vmem>>, vector<1024x64xf32>
    %cst = arith.constant dense<0.000000e+00> : vector<8x64xf32>
    %2 = tpu.matmul %0, %1, %cst {dimension_numbers = #tpu.dot_dimension_numbers<[1], [0], [0], [1], [0, 0, 1, 1], [], []>} : vector<8x1024xf32>, vector<1024x64xf32>, vector<8x64xf32> -> vector<8x64xf32>
    %c0_3 = arith.constant 0 : index
    %c0_4 = arith.constant 0 : index
    %3 = vector.load %arg3[%c0_3, %c0_4] : memref<64x4xf32, #tpu.memory_space<vmem>>, vector<64x4xf32>
    %cst_5 = arith.constant dense<0.000000e+00> : vector<8x4xf32>
    %4 = tpu.matmul %2, %3, %cst_5 {dimension_numbers = #tpu.dot_dimension_numbers<[1], [0], [0], [1], [0, 0, 1, 1], [], []>} : vector<8x64xf32>, vector<64x4xf32>, vector<8x4xf32> -> vector<8x4xf32>
    %cst_6 = arith.constant 0.000000e+00 : f32
    %5 = vector.broadcast %cst_6 : f32 to vector<8x4xf32>
    %6 = arith.maximumf %4, %5 : vector<8x4xf32>
    %c0_7 = arith.constant 0 : index
    %c0_8 = arith.constant 0 : index
    %7 = vector.load %arg4[%c0_7, %c0_8] : memref<4x64xf32, #tpu.memory_space<vmem>>, vector<4x64xf32>
    %cst_9 = arith.constant dense<0.000000e+00> : vector<8x64xf32>
    %8 = tpu.matmul %6, %7, %cst_9 {dimension_numbers = #tpu.dot_dimension_numbers<[1], [0], [0], [1], [0, 0, 1, 1], [], []>} : vector<8x4xf32>, vector<4x64xf32>, vector<8x64xf32> -> vector<8x64xf32>
    %9 = arith.negf %8 : vector<8x64xf32>
    %10 = math.exp %9 : vector<8x64xf32>
    %cst_10 = arith.constant 1.000000e+00 : f32
    %11 = vector.broadcast %cst_10 : f32 to vector<8x64xf32>
    %12 = arith.addf %11, %10 : vector<8x64xf32>
    %13 = arith.divf %11, %12 : vector<8x64xf32>
    %c0_11 = arith.constant 0 : index
    %c0_12 = arith.constant 0 : index
    %14 = vector.load %arg5[%c0_11, %c0_12] : memref<64x1024xf32, #tpu.memory_space<vmem>>, vector<64x1024xf32>
    %cst_13 = arith.constant dense<0.000000e+00> : vector<8x1024xf32>
    %15 = tpu.matmul %13, %14, %cst_13 {dimension_numbers = #tpu.dot_dimension_numbers<[1], [0], [0], [1], [0, 0, 1, 1], [], []>} : vector<8x64xf32>, vector<64x1024xf32>, vector<8x1024xf32> -> vector<8x1024xf32>
    %16 = arith.mulf %0, %15 : vector<8x1024xf32>
    %c0_14 = arith.constant 0 : index
    %c0_15 = arith.constant 0 : index
    %17 = vector.load %arg6[%c0_14, %c0_15] : memref<8x1024xf32, #tpu.memory_space<vmem>>, vector<8x1024xf32>
    tpu.vector_store %arg6[%c0_14, %c0_15], %16 {strides = array<i32>} : memref<8x1024xf32, #tpu.memory_space<vmem>>, vector<8x1024xf32>,
    return
  }
  func.func @transform_0(%arg0: i32) -> (i32, i32) {
    %c0_i32 = arith.constant 0 : i32
    %c0_i32_0 = arith.constant 0 : i32
    return %arg0, %c0_i32 : i32, i32
  }
  func.func @transform_1(%arg0: i32) -> (i32, i32) {
    %c0_i32 = arith.constant 0 : i32
    %c0_i32_0 = arith.constant 0 : i32
    %c0_i32_1 = arith.constant 0 : i32
    return %c0_i32, %c0_i32_0 : i32, i32
  }
  func.func @transform_2(%arg0: i32) -> (i32, i32) {
    %c0_i32 = arith.constant 0 : i32
    %c0_i32_0 = arith.constant 0 : i32
    %c0_i32_1 = arith.constant 0 : i32
    return %c0_i32, %c0_i32_0 : i32, i32
  }
  func.func @transform_3(%arg0: i32) -> (i32, i32) {
    %c0_i32 = arith.constant 0 : i32
    %c0_i32_0 = arith.constant 0 : i32
    %c0_i32_1 = arith.constant 0 : i32
    return %c0_i32, %c0_i32_0 : i32, i32
  }
  func.func @transform_4(%arg0: i32) -> (i32, i32) {
    %c0_i32 = arith.constant 0 : i32
    %c0_i32_0 = arith.constant 0 : i32
    %c0_i32_1 = arith.constant 0 : i32
    return %c0_i32, %c0_i32_0 : i32, i32
  }
  func.func @transform_5(%arg0: i32) -> (i32, i32) {
    %c0_i32 = arith.constant 0 : i32
    %c0_i32_0 = arith.constant 0 : i32
    return %arg0, %c0_i32 : i32, i32
  }
}

</mosaic_0001>

<bundles_post_ra>
// kernel: tpu_custom_call.1
= control target key start
LH: loop header
LB: loop body
LE: loop exit
PB: predicated region body
PF: predicated region fallthrough
CT: control target
= control target key end

     0   :  { %10 = vsyncpa [#allocation3], 0  ;;  %s2358_s0 = inlined_call_operand.vmem [shape: f32[16,1024], index: 0, kind: input, shape index: {}]   ;;  %s2359_s1 = inlined_call_operand.vmem [shape: f32[1024,64], index: 1, kind: input, shape index: {}]   ;;  %s2360_s2 = inlined_call_operand.vmem [shape: f32[64,4], index: 2, kind: input, shape index: {}]   ;;  %s2361_s3 = inlined_call_operand.vmem [shape: f32[4,64], index: 3, kind: input, shape index: {}]   ;;  %s2362_s4 = inlined_call_operand.vmem [shape: f32[64,1024], index: 4, kind: input, shape index: {}]   ;;  %s2363_s5 = inlined_call_operand.hbm [shape: f32[16,1024], index: 5, kind: output, shape index: {}]  }
   0x1   :  { %12 = vsyncpa [#allocation3 + $0x1], 0  ;;  %s1585_s18 = smov 0   ;;  %s1587_s19 = smov 0  }
   0x2   :  { %s1589_s20 = smov 0   ;;  %s1591_s21 = smov 0  }
   0x3 LB: > { %s1606_s22 = sadd.s32 4294967295, %s1550_s21   ;;  %s1248_s23 = sadd.s32 4294967294, %s1550_s21   ;;  %s1550_s21 = sphi %s1591_s21, %s2369_s21   ;;  %s1546_s20 = sphi %s1589_s20, %s2368_s20   ;;  %s1542_s19 = sphi %s1587_s19, %s2367_s19   ;;  %s1538_s18 = sphi %s1585_s18, %s2366_s18  }
   0x4   : > { %s1610_s24 = sadd.s32 1, %s1550_s21   ;;  %s135_s25 = sadd.s32 1, %s1546_s20 }
   0x5   : > { %s132_s26 = ssub.s32 %s1550_s21, %s1610_s24  ;;  %p145_p0 = scmp.ne.s32.totalorder %s1546_s20, %s1542_s19 }
   0x6   : > { %p133_p1 = scmp.eq.s32.totalorder %s132_s26, 0  ;;  %p146_p2 = scmp.eq.s32.totalorder %s1606_s22, 1 }
   0x7   : > { %p151_p3 = scmp.ne.s32.totalorder %s1542_s19, %s1538_s18  ;;  %p152_p4 = scmp.eq.s32.totalorder %s1248_s23, 1 }
   0x8   : > { %s1621_s27 = scalar_select %p133_p1, %s1546_s20, %s135_s25  }
   0x9   : > { %p1623_p5 = por %p146_p2, %p145_p0  ;;  %p1627_p6 = por %p152_p4, %p151_p3 }
   0xa   : > { %p1251_p7 = scmp.ge.s32.totalorder %s1550_s21, 1  ;;  %p190_p8 = scmp.lt.s32.totalorder %s1550_s21, 3 }
   0xc   : > { %p191_p9 = pnand %p1251_p7, %p190_p8 }
   0xd   : > { %p218_p10 = scmp.lt.s32.totalorder (!%p191_p9), %s1606_s22, 1  ;;  %s215_s6 = sand.u32 (!%p191_p9), 1, %s1542_s19  }
   0xe   : > { %194 = sbr.rel (%p191_p9) target bundleno = 936 (0x3a8), region = 40  ;;  %s1554_s16 = smov (!%p191_p9), [#allocation2]  }
   0xf   : > { %s1494_s17 = sshll.u32 (!%p191_p9), %s1554_s16, 4  ;;  %s1495_s17 = int_to_ptr.vmem [resolvable:$false] %s1494_s17 }
  0x10   : > { %s1496_s23 = scalar_lea.vmem (!%p191_p9), %s1495_s17, 2048 }
  0x13   : > { %v262_v0 = vld [vmem:[%s2359_s1 + $0xf8] sm:$0xff]  ;;  %v261_v4 = vld [vmem:[%s2359_s1 + $0xf0] sm:$0xff]  ;;  %v260_v8 = vld [vmem:[%s2359_s1 + $0xe8] sm:$0xff]  ;;  %s1769_s13 = scalar_select %p218_p10, %s1606_s22, 1  ;;  %vm1553_vm0 = vmmov 0   ;;  %vm727_vm1 = vcmask 1043456  }
  0x14   : > { %v294_v1 = vld [vmem:[%s2359_s1 + $0x1f8] sm:$0xff]  ;;  %1270 = vmatprep.subr.mxu0 %v262_v0  ;;  %v293_v5 = vld [vmem:[%s2359_s1 + $0x1f0] sm:$0xff]  ;;  %v292_v9 = vld [vmem:[%s2359_s1 + $0x1e8] sm:$0xff]  ;;  %vm647_vm2 = vcmask 523264   ;;  %vm723_vm3 = vcmask 31744  }
  0x15   : > { %v246_v2 = vld [vmem:[%s2359_s1 + $0x78] sm:$0xff]  ;;  %1305 = vmatprep.subr.mxu1 %v294_v1  ;;  %v245_v6 = vld [vmem:[%s2359_s1 + $0x70] sm:$0xff]  ;;  %v244_v10 = vld [vmem:[%s2359_s1 + $0x68] sm:$0xff]  ;;  %s1268_s15 = sshll.u32 %s1769_s13, 6  ;;  %s1269_s13 = sshll.u32 %s1606_s22, 10 }
  0x16   : > { %v278_v3 = vld [vmem:[%s2359_s1 + $0x178] sm:$0xff]  ;;  %1271 = vmatpush3.msra.mxu0 %v246_v2  ;;  %v277_v7 = vld [vmem:[%s2359_s1 + $0x170] sm:$0xff]  ;;  %v276_v11 = vld [vmem:[%s2359_s1 + $0x168] sm:$0xff]  ;;  %s1817_s14 = scalar_lea.vmem %s2358_s0, %s1268_s15  ;;  %s2321_s11 = scalar_lea.hbm %s2363_s5, %s1269_s13 }
  0x17   : > { %1306 = vmatpush3.msra.mxu1 %v278_v3  ;;  %1272 = vmatprep.subr.mxu0 %v261_v4  ;;  %v259_v12 = vld [vmem:[%s2359_s1 + $0xe0] sm:$0xff]  ;;  %v258_v16 = vld [vmem:[%s2359_s1 + $0xd8] sm:$0xff]  ;;  %v257_v20 = vld [vmem:[%s2359_s1 + $0xd0] sm:$0xff]  ;;  %s1175_s22 = scalar_lea.sflag [#allocation3], %s215_s6 }
  0x18   : > { %1307 = vmatprep.subr.mxu1 %v293_v5  ;;  %1273 = vmatpush3.msra.mxu0 %v245_v6  ;;  %v291_v13 = vld [vmem:[%s2359_s1 + $0x1e0] sm:$0xff]  ;;  %v290_v17 = vld [vmem:[%s2359_s1 + $0x1d8] sm:$0xff]  ;;  %v289_v21 = vld [vmem:[%s2359_s1 + $0x1d0] sm:$0xff] }
  0x19   : > { %1308 = vmatpush3.msra.mxu1 %v277_v7  ;;  %1274 = vmatprep.subr.mxu0 %v260_v8  ;;  %v243_v14 = vld [vmem:[%s2359_s1 + $0x60] sm:$0xff]  ;;  %v242_v18 = vld [vmem:[%s2359_s1 + $0x58] sm:$0xff]  ;;  %v241_v22 = vld [vmem:[%s2359_s1 + $0x50] sm:$0xff] }
  0x1a   : > { %1309 = vmatprep.subr.mxu1 %v292_v9  ;;  %v275_v15 = vld [vmem:[%s2359_s1 + $0x160] sm:$0xff]  ;;  %1275 = vmatpush3.msra.mxu0 %v244_v10  ;;  %v274_v19 = vld [vmem:[%s2359_s1 + $0x158] sm:$0xff]  ;;  %v273_v23 = vld [vmem:[%s2359_s1 + $0x150] sm:$0xff] }
  0x1b   : > { %1310 = vmatpush3.msra.mxu1 %v276_v11  ;;  %1276 = vmatprep.subr.mxu0 %v259_v12  ;;  %v256_v24 = vld [vmem:[%s2359_s1 + $0xc8] sm:$0xff]  ;;  %v255_v28 = vld [vmem:[%s2359_s1 + $0xc0] sm:$0xff]  ;;  %v254_v32 = vld [vmem:[%s2359_s1 + $0xb8] sm:$0xff] }
  0x1c   : > { %1311 = vmatprep.subr.mxu1 %v291_v13  ;;  %1277 = vmatpush3.msra.mxu0 %v243_v14  ;;  %v288_v25 = vld [vmem:[%s2359_s1 + $0x1c8] sm:$0xff]  ;;  %v287_v29 = vld [vmem:[%s2359_s1 + $0x1c0] sm:$0xff]  ;;  %v286_v33 = vld [vmem:[%s2359_s1 + $0x1b8] sm:$0xff] }
  0x1d   : > { %1312 = vmatpush3.msra.mxu1 %v275_v15  ;;  %1278 = vmatprep.subr.mxu0 %v258_v16  ;;  %v240_v26 = vld [vmem:[%s2359_s1 + $0x48] sm:$0xff]  ;;  %v239_v30 = vld [vmem:[%s2359_s1 + $0x40] sm:$0xff]  ;;  %v238_v34 = vld [vmem:[%s2359_s1 + $0x38] sm:$0xff] }
  0x1e   : > { %1313 = vmatprep.subr.mxu1 %v290_v17  ;;  %1279 = vmatpush3.msra.mxu0 %v242_v18  ;;  %v272_v27 = vld [vmem:[%s2359_s1 + $0x148] sm:$0xff]  ;;  %v271_v31 = vld [vmem:[%s2359_s1 + $0x140] sm:$0xff]  ;;  %v270_v35 = vld [vmem:[%s2359_s1 + $0x138] sm:$0xff] }
  0x1f   : > { %1314 = vmatpush3.msra.mxu1 %v274_v19  ;;  %1280 = vmatprep.subr.mxu0 %v257_v20  ;;  %v253_v36 = vld [vmem:[%s2359_s1 + $0xb0] sm:$0xff]  ;;  %v252_v40 = vld [vmem:[%s2359_s1 + $0xa8] sm:$0xff]  ;;  %v251_v44 = vld [vmem:[%s2359_s1 + $0xa0] sm:$0xff] }
  0x20   : > { %1315 = vmatprep.subr.mxu1 %v289_v21  ;;  %1281 = vmatpush3.msra.mxu0 %v241_v22  ;;  %v285_v37 = vld [vmem:[%s2359_s1 + $0x1b0] sm:$0xff]  ;;  %v284_v41 = vld [vmem:[%s2359_s1 + $0x1a8] sm:$0xff]  ;;  %v283_v45 = vld [vmem:[%s2359_s1 + $0x1a0] sm:$0xff] }
  0x21   : > { %1316 = vmatpush3.msra.mxu1 %v273_v23  ;;  %1282 = vmatprep.subr.mxu0 %v256_v24  ;;  %v237_v38 = vld [vmem:[%s2359_s1 + $0x30] sm:$0xff]  ;;  %v236_v42 = vld [vmem:[%s2359_s1 + $0x28] sm:$0xff]  ;;  %v235_v46 = vld [vmem:[%s2359_s1 + $0x20] sm:$0xff] }
  0x22   : > { %1317 = vmatprep.subr.mxu1 %v288_v25  ;;  %1283 = vmatpush3.msra.mxu0 %v240_v26  ;;  %v269_v39 = vld [vmem:[%s2359_s1 + $0x130] sm:$0xff]  ;;  %v268_v43 = vld [vmem:[%s2359_s1 + $0x128] sm:$0xff]  ;;  %v267_v47 = vld [vmem:[%s2359_s1 + $0x120] sm:$0xff] }
  0x23   : > { %1318 = vmatpush3.msra.mxu1 %v272_v27  ;;  %1284 = vmatprep.subr.mxu0 %v255_v28  ;;  %v250_v48 = vld [vmem:[%s2359_s1 + $0x98] sm:$0xff]  ;;  %v249_v52 = vld [vmem:[%s2359_s1 + $0x90] sm:$0xff]  ;;  %v248_v56 = vld [vmem:[%s2359_s1 + $0x88] sm:$0xff] }
  0x24   : > { %1319 = vmatprep.subr.mxu1 %v287_v29  ;;  %1285 = vmatpush3.msra.mxu0 %v239_v30  ;;  %v282_v49 = vld [vmem:[%s2359_s1 + $0x198] sm:$0xff]  ;;  %v281_v53 = vld [vmem:[%s2359_s1 + $0x190] sm:$0xff]  ;;  %v280_v57 = vld [vmem:[%s2359_s1 + $0x188] sm:$0xff] }
  0x25   : > { %1320 = vmatpush3.msra.mxu1 %v271_v31  ;;  %1286 = vmatprep.subr.mxu0 %v254_v32  ;;  %v234_v50 = vld [vmem:[%s2359_s1 + $0x18] sm:$0xff]  ;;  %v233_v54 = vld [vmem:[%s2359_s1 + $0x10] sm:$0xff]  ;;  %v232_v58 = vld [vmem:[%s2359_s1 + $0x8] sm:$0xff] }
  0x26   : > { %1321 = vmatprep.subr.mxu1 %v286_v33  ;;  %1287 = vmatpush3.msra.mxu0 %v238_v34  ;;  %v266_v51 = vld [vmem:[%s2359_s1 + $0x118] sm:$0xff]  ;;  %v265_v55 = vld [vmem:[%s2359_s1 + $0x110] sm:$0xff]  ;;  %v264_v59 = vld [vmem:[%s2359_s1 + $0x108] sm:$0xff] }
  0x27   : > { %1322 = vmatpush3.msra.mxu1 %v270_v35  ;;  %1288 = vmatprep.subr.mxu0 %v253_v36  ;;  %v247_v60 = vld [vmem:[%s2359_s1 + $0x80] sm:$0xff]  ;;  %v1835_v63 = vld [vmem:[%s1817_s14 + $0x8] sm:$0xff]  ;;  %v1841_v1 = vld [vmem:[%s1817_s14 + $0x18] sm:$0xff] }
  0x28   : > { %1323 = vmatprep.subr.mxu1 %v285_v37  ;;  %1289 = vmatpush3.msra.mxu0 %v237_v38  ;;  %v279_v61 = vld [vmem:[%s2359_s1 + $0x180] sm:$0xff]  ;;  %v1847_v3 = vld [vmem:[%s1817_s14 + $0x10] sm:$0xff]  ;;  %v326_v4 = vld [vmem:[%s2359_s1 + $0x2f8] sm:$0xff] }
  0x29   : > { %1324 = vmatpush3.msra.mxu1 %v269_v39  ;;  %1290 = vmatprep.subr.mxu0 %v252_v40  ;;  %v231_v62 = vld [vmem:[%s2359_s1] sm:$0xff]  ;;  %v358_v5 = vld [vmem:[%s2359_s1 + $0x3f8] sm:$0xff]  ;;  %v325_v8 = vld [vmem:[%s2359_s1 + $0x2f0] sm:$0xff] }
  0x2a   : > { %1325 = vmatprep.subr.mxu1 %v284_v41  ;;  %1291 = vmatpush3.msra.mxu0 %v236_v42  ;;  %v263_v0 = vld [vmem:[%s2359_s1 + $0x100] sm:$0xff]  ;;  %v310_v6 = vld [vmem:[%s2359_s1 + $0x278] sm:$0xff]  ;;  %v357_v9 = vld [vmem:[%s2359_s1 + $0x3f0] sm:$0xff] }
  0x2b   : > { %1326 = vmatpush3.msra.mxu1 %v268_v43  ;;  %1292 = vmatprep.subr.mxu0 %v251_v44  ;;  %v1844_v2 = vld [vmem:[%s1817_s14] sm:$0xff]  ;;  %v342_v7 = vld [vmem:[%s2359_s1 + $0x378] sm:$0xff]  ;;  %v309_v10 = vld [vmem:[%s2359_s1 + $0x270] sm:$0xff] }
  0x2c   : > { %1327 = vmatprep.subr.mxu1 %v283_v45  ;;  %1293 = vmatpush3.msra.mxu0 %v235_v46  ;;  %v341_v11 = vld [vmem:[%s2359_s1 + $0x370] sm:$0xff]  ;;  %v324_v12 = vld [vmem:[%s2359_s1 + $0x2e8] sm:$0xff]  ;;  %v323_v16 = vld [vmem:[%s2359_s1 + $0x2e0] sm:$0xff] }
  0x2d   : > { %1328 = vmatpush3.msra.mxu1 %v267_v47  ;;  %1294 = vmatprep.subr.mxu0 %v250_v48  ;;  %v356_v13 = vld [vmem:[%s2359_s1 + $0x3e8] sm:$0xff]  ;;  %v355_v17 = vld [vmem:[%s2359_s1 + $0x3e0] sm:$0xff]  ;;  %v322_v20 = vld [vmem:[%s2359_s1 + $0x2d8] sm:$0xff] }
  0x2e   : > { %1329 = vmatprep.subr.mxu1 %v282_v49  ;;  %1295 = vmatpush3.msra.mxu0 %v234_v50  ;;  %v308_v14 = vld [vmem:[%s2359_s1 + $0x268] sm:$0xff]  ;;  %v307_v18 = vld [vmem:[%s2359_s1 + $0x260] sm:$0xff]  ;;  %v354_v21 = vld [vmem:[%s2359_s1 + $0x3d8] sm:$0xff] }
  0x2f   : > { %1330 = vmatpush3.msra.mxu1 %v266_v51  ;;  %1296 = vmatprep.subr.mxu0 %v249_v52  ;;  %v340_v15 = vld [vmem:[%s2359_s1 + $0x368] sm:$0xff]  ;;  %v339_v19 = vld [vmem:[%s2359_s1 + $0x360] sm:$0xff]  ;;  %v306_v22 = vld [vmem:[%s2359_s1 + $0x258] sm:$0xff] }
  0x30   : > { %1331 = vmatprep.subr.mxu1 %v281_v53  ;;  %1297 = vmatpush3.msra.mxu0 %v233_v54  ;;  %v338_v23 = vld [vmem:[%s2359_s1 + $0x358] sm:$0xff]  ;;  %v321_v24 = vld [vmem:[%s2359_s1 + $0x2d0] sm:$0xff]  ;;  %v320_v28 = vld [vmem:[%s2359_s1 + $0x2c8] sm:$0xff] }
  0x31   : > { %1332 = vmatpush3.msra.mxu1 %v265_v55  ;;  %1298 = vmatprep.subr.mxu0 %v248_v56  ;;  %v353_v25 = vld [vmem:[%s2359_s1 + $0x3d0] sm:$0xff]  ;;  %v352_v29 = vld [vmem:[%s2359_s1 + $0x3c8] sm:$0xff]  ;;  %v319_v32 = vld [vmem:[%s2359_s1 + $0x2c0] sm:$0xff] }
  0x32   : > { %1333 = vmatprep.subr.mxu1 %v280_v57  ;;  %1299 = vmatpush3.msra.mxu0 %v232_v58  ;;  %v305_v26 = vld [vmem:[%s2359_s1 + $0x250] sm:$0xff]  ;;  %v304_v30 = vld [vmem:[%s2359_s1 + $0x248] sm:$0xff]  ;;  %v351_v33 = vld [vmem:[%s2359_s1 + $0x3c0] sm:$0xff] }
  0x33   : > { %1334 = vmatpush3.msra.mxu1 %v264_v59  ;;  %1300 = vmatprep.subr.mxu0 %v247_v60  ;;  %v337_v27 = vld [vmem:[%s2359_s1 + $0x350] sm:$0xff]  ;;  %v336_v31 = vld [vmem:[%s2359_s1 + $0x348] sm:$0xff]  ;;  %v303_v34 = vld [vmem:[%s2359_s1 + $0x240] sm:$0xff] }
  0x34   : > { %1335 = vmatprep.subr.mxu1 %v279_v61  ;;  %1301 = vmatpush3.msra.mxu0 %v231_v62  ;;  %v335_v35 = vld [vmem:[%s2359_s1 + $0x340] sm:$0xff]  ;;  %v318_v36 = vld [vmem:[%s2359_s1 + $0x2b8] sm:$0xff]  ;;  %v317_v40 = vld [vmem:[%s2359_s1 + $0x2b0] sm:$0xff] }
  0x35   : > { %423 = vmatprep.mubr.f32.mxu0 %v1835_v63  ;;  %1336 = vmatpush3.msra.mxu1 %v263_v0  ;;  %v350_v37 = vld [vmem:[%s2359_s1 + $0x3b8] sm:$0xff]  ;;  %v349_v41 = vld [vmem:[%s2359_s1 + $0x3b0] sm:$0xff]  ;;  %v316_v44 = vld [vmem:[%s2359_s1 + $0x2a8] sm:$0xff] }
  0x36   : > { %493 = vmatprep.mubr.f32.mxu1 %v1841_v1  ;;  %424 = vmatmul.mubr.f32.vlgmr.msra.gmra.mxu0 %v1844_v2  ;;  %v302_v38 = vld [vmem:[%s2359_s1 + $0x238] sm:$0xff]  ;;  %v301_v42 = vld [vmem:[%s2359_s1 + $0x230] sm:$0xff]  ;;  %v348_v45 = vld [vmem:[%s2359_s1 + $0x3a8] sm:$0xff] }
  0x37   : > { %494 = vmatmul.mubr.f32.vlgmr.msra.gmra.mxu1 %v1847_v3  ;;  %1340 = vmatprep.subr.mxu0 %v326_v4  ;;  %v334_v39 = vld [vmem:[%s2359_s1 + $0x338] sm:$0xff]  ;;  %v333_v43 = vld [vmem:[%s2359_s1 + $0x330] sm:$0xff]  ;;  %v300_v46 = vld [vmem:[%s2359_s1 + $0x228] sm:$0xff] }
  0x38   : > { %1375 = vmatprep.subr.mxu1 %v358_v5  ;;  %1341 = vmatpush3.msra.mxu0 %v310_v6  ;;  %v332_v47 = vld [vmem:[%s2359_s1 + $0x328] sm:$0xff]  ;;  %v315_v48 = vld [vmem:[%s2359_s1 + $0x2a0] sm:$0xff]  ;;  %v314_v52 = vld [vmem:[%s2359_s1 + $0x298] sm:$0xff] }
  0x39   : > { %1376 = vmatpush3.msra.mxu1 %v342_v7  ;;  %1342 = vmatprep.subr.mxu0 %v325_v8  ;;  %v347_v49 = vld [vmem:[%s2359_s1 + $0x3a0] sm:$0xff]  ;;  %v346_v53 = vld [vmem:[%s2359_s1 + $0x398] sm:$0xff]  ;;  %v313_v56 = vld [vmem:[%s2359_s1 + $0x290] sm:$0xff] }
  0x3a   : > { %1377 = vmatprep.subr.mxu1 %v357_v9  ;;  %1343 = vmatpush3.msra.mxu0 %v309_v10  ;;  %v299_v50 = vld [vmem:[%s2359_s1 + $0x220] sm:$0xff]  ;;  %v298_v54 = vld [vmem:[%s2359_s1 + $0x218] sm:$0xff]  ;;  %v345_v57 = vld [vmem:[%s2359_s1 + $0x390] sm:$0xff] }
  0x3b   : > { %1378 = vmatpush3.msra.mxu1 %v341_v11  ;;  %1344 = vmatprep.subr.mxu0 %v324_v12  ;;  %v331_v51 = vld [vmem:[%s2359_s1 + $0x320] sm:$0xff]  ;;  %v330_v55 = vld [vmem:[%s2359_s1 + $0x318] sm:$0xff]  ;;  %v297_v58 = vld [vmem:[%s2359_s1 + $0x210] sm:$0xff] }
  0x3c   : > { %1379 = vmatprep.subr.mxu1 %v356_v13  ;;  %1345 = vmatpush3.msra.mxu0 %v308_v14  ;;  %v329_v59 = vld [vmem:[%s2359_s1 + $0x310] sm:$0xff]  ;;  %v312_v60 = vld [vmem:[%s2359_s1 + $0x288] sm:$0xff]  ;;  %v311_v4 = vld [vmem:[%s2359_s1 + $0x280] sm:$0xff]  ;;  %v1552_v13 = vmov 0.0  }
  0x3d   : > { %1380 = vmatpush3.msra.mxu1 %v340_v15  ;;  %1346 = vmatprep.subr.mxu0 %v323_v16  ;;  %v344_v61 = vld [vmem:[%s2359_s1 + $0x388] sm:$0xff]  ;;  %v343_v5 = vld [vmem:[%s2359_s1 + $0x380] sm:$0xff]  ;;  %v2049_v9 = vld [vmem:[%s1817_s14 + $0x38] sm:$0xff] }
  0x3e   : > { %1381 = vmatprep.subr.mxu1 %v355_v17  ;;  %1347 = vmatpush3.msra.mxu0 %v307_v18  ;;  %v296_v62 = vld [vmem:[%s2359_s1 + $0x208] sm:$0xff]  ;;  %v295_v6 = vld [vmem:[%s2359_s1 + $0x200] sm:$0xff]  ;;  %v2055_v11 = vld [vmem:[%s1817_s14 + $0x30] sm:$0xff] }
  0x3f   : > { %1382 = vmatpush3.msra.mxu1 %v339_v19  ;;  %1348 = vmatprep.subr.mxu0 %v322_v20  ;;  %v328_v0 = vld [vmem:[%s2359_s1 + $0x308] sm:$0xff]  ;;  %v327_v8 = vld [vmem:[%s2359_s1 + $0x300] sm:$0xff]  ;;  %v646_v12 = vld [vmem:[%s2360_s2 + $0x38] sm:$0xff] }
  0x40   : > { %1383 = vmatprep.subr.mxu1 %v354_v21  ;;  %1349 = vmatpush3.msra.mxu0 %v306_v22  ;;  %v2043_v7 = vld [vmem:[%s1817_s14 + $0x28] sm:$0xff]  ;;  %v2052_v10 = vld [vmem:[%s1817_s14 + $0x20] sm:$0xff]  ;;  %v645_v14 = vld [vmem:[%s2360_s2 + $0x30] sm:$0xff]  ;;  %s1252_s14 = sshll.u32 %s215_s6, 6 }
  0x41   : > { %1384 = vmatpush3.msra.mxu1 %v338_v23  ;;  %1350 = vmatprep.subr.mxu0 %v321_v24  ;;  %v644_v15 = vld [vmem:[%s2360_s2 + $0x28] sm:$0xff]  ;;  %v643_v16 = vld [vmem:[%s2360_s2 + $0x20] sm:$0xff]  ;;  %v642_v17 = vld [vmem:[%s2360_s2 + $0x18] sm:$0xff]  ;;  %s217_s7 = scalar_lea.vmem [#allocation2], %s1252_s14 }
  0x42   : > { %1385 = vmatprep.subr.mxu1 %v353_v25  ;;  %1351 = vmatpush3.msra.mxu0 %v305_v26  ;;  %v641_v18 = vld [vmem:[%s2360_s2 + $0x10] sm:$0xff]  ;;  %v640_v19 = vld [vmem:[%s2360_s2 + $0x8] sm:$0xff]  ;;  %v639_v20 = vld [vmem:[%s2360_s2] sm:$0xff]  ;;  %s1189_s8 = sshll.u32 %s217_s7, 4  ;;  %s1190_s8 = int_to_ptr.vmem [resolvable:$true] %s1189_s8 }
  0x43   : > { %1386 = vmatpush3.msra.mxu1 %v337_v27  ;;  %1352 = vmatprep.subr.mxu0 %v320_v28  ;;  %v722_v21 = vld [vmem:[%s2361_s3] sm:$0xf]  ;;  %s1490_s12 = scalar_lea.vmem %s1190_s8, 1024  ;;  %p1497_p0 = scmp.lt.s32.totalorder %s1190_s8, %s1495_s17 }
  0x44   : > { %1387 = vmatprep.subr.mxu1 %v352_v29  ;;  %1353 = vmatpush3.msra.mxu0 %v304_v30  ;;  %p1491_p11 = scmp.ne.s32.totalorder %s1190_s8, %s1490_s12  ;;  %p1498_p1 = scmp.lt.s32.totalorder %s1496_s23, %s1490_s12 }
  0x45   : > { %1388 = vmatpush3.msra.mxu1 %v336_v31  ;;  %1354 = vmatprep.subr.mxu0 %v319_v32 }
  0x46   : > { %1389 = vmatprep.subr.mxu1 %v351_v33  ;;  %1355 = vmatpush3.msra.mxu0 %v303_v34  ;;  %p1492_p12 = pnand %p1491_p11, %p1623_p5  ;;  %p1499_p2 = por %p1498_p1, %p1497_p0 }
  0x47   : > { %1390 = vmatpush3.msra.mxu1 %v335_v35  ;;  %1356 = vmatprep.subr.mxu0 %v318_v36 }
  0x48   : > { %1391 = vmatprep.subr.mxu1 %v350_v37  ;;  %1357 = vmatpush3.msra.mxu0 %v302_v38  ;;  %p1493_p13 = pneg %p1492_p12 }
  0x49   : > { %1392 = vmatpush3.msra.mxu1 %v334_v39  ;;  %1358 = vmatprep.subr.mxu0 %v317_v40  ;;  %v864_v40 = vld [vmem:[%s2362_s4 + $0x1c8] sm:$0xff] }
  0x4a   : > { %1393 = vmatprep.subr.mxu1 %v349_v41  ;;  %1359 = vmatpush3.msra.mxu0 %v301_v42  ;;  %v866_v41 = vld [vmem:[%s2362_s4 + $0x1d8] sm:$0xff]  ;;  %v863_v42 = vld [vmem:[%s2362_s4 + $0x1c0] sm:$0xff]  ;;  %p1500_p3 = pnand %p1499_p2, %p1493_p13 }
  0x4b   : > { %1394 = vmatpush3.msra.mxu1 %v333_v43  ;;  %1360 = vmatprep.subr.mxu0 %v316_v44  ;;  %v865_v43 = vld [vmem:[%s2362_s4 + $0x1d0] sm:$0xff]  ;;  %v856_v44 = vld [vmem:[%s2362_s4 + $0x188] sm:$0xff] }
  0x4c   : > { %1395 = vmatprep.subr.mxu1 %v348_v45  ;;  %1361 = vmatpush3.msra.mxu0 %v300_v46  ;;  %v858_v45 = vld [vmem:[%s2362_s4 + $0x198] sm:$0xff]  ;;  %v855_v46 = vld [vmem:[%s2362_s4 + $0x180] sm:$0xff] }
  0x4d   : > { %1396 = vmatpush3.msra.mxu1 %v332_v47  ;;  %1362 = vmatprep.subr.mxu0 %v315_v48  ;;  %v857_v47 = vld [vmem:[%s2362_s4 + $0x190] sm:$0xff]  ;;  %v848_v48 = vld [vmem:[%s2362_s4 + $0x148] sm:$0xff] }
  0x4e   : > { %1397 = vmatprep.subr.mxu1 %v347_v49  ;;  %1363 = vmatpush3.msra.mxu0 %v299_v50  ;;  %v850_v49 = vld [vmem:[%s2362_s4 + $0x158] sm:$0xff]  ;;  %v847_v50 = vld [vmem:[%s2362_s4 + $0x140] sm:$0xff] }
  0x4f   : > { %1398 = vmatpush3.msra.mxu1 %v331_v51  ;;  %1364 = vmatprep.subr.mxu0 %v314_v52  ;;  %v849_v51 = vld [vmem:[%s2362_s4 + $0x150] sm:$0xff]  ;;  %v840_v52 = vld [vmem:[%s2362_s4 + $0x108] sm:$0xff] }
  0x50   : > { %1399 = vmatprep.subr.mxu1 %v346_v53  ;;  %1365 = vmatpush3.msra.mxu0 %v298_v54  ;;  %v842_v53 = vld [vmem:[%s2362_s4 + $0x118] sm:$0xff]  ;;  %v839_v54 = vld [vmem:[%s2362_s4 + $0x100] sm:$0xff] }
  0x51   : > { %1400 = vmatpush3.msra.mxu1 %v330_v55  ;;  %1366 = vmatprep.subr.mxu0 %v313_v56  ;;  %v841_v55 = vld [vmem:[%s2362_s4 + $0x110] sm:$0xff]  ;;  %v832_v56 = vld [vmem:[%s2362_s4 + $0xc8] sm:$0xff] }
  0x52   : > { %1401 = vmatprep.subr.mxu1 %v345_v57  ;;  %1367 = vmatpush3.msra.mxu0 %v297_v58  ;;  %v834_v57 = vld [vmem:[%s2362_s4 + $0xd8] sm:$0xff]  ;;  %v831_v58 = vld [vmem:[%s2362_s4 + $0xc0] sm:$0xff] }
  0x53   : > { %1402 = vmatpush3.msra.mxu1 %v329_v59  ;;  %1368 = vmatprep.subr.mxu0 %v312_v60  ;;  %v833_v59 = vld [vmem:[%s2362_s4 + $0xd0] sm:$0xff]  ;;  %v824_v60 = vld [vmem:[%s2362_s4 + $0x88] sm:$0xff] }
  0x54   : > { %1403 = vmatprep.subr.mxu1 %v344_v61  ;;  %1369 = vmatpush3.msra.mxu0 %v296_v62  ;;  %v826_v61 = vld [vmem:[%s2362_s4 + $0x98] sm:$0xff]  ;;  %v823_v62 = vld [vmem:[%s2362_s4 + $0x80] sm:$0xff] }
  0x55   : > { %1404 = vmatpush3.msra.mxu1 %v328_v0  ;;  %1370 = vmatprep.subr.mxu0 %v311_v4  ;;  %v825_v0 = vld [vmem:[%s2362_s4 + $0x90] sm:$0xff]  ;;  %v816_v4 = vld [vmem:[%s2362_s4 + $0x48] sm:$0xff] }
  0x56   : > { %1405 = vmatprep.subr.mxu1 %v343_v5  ;;  %1371 = vmatpush3.msra.mxu0 %v295_v6  ;;  %v818_v5 = vld [vmem:[%s2362_s4 + $0x58] sm:$0xff]  ;;  %v815_v6 = vld [vmem:[%s2362_s4 + $0x40] sm:$0xff] }
  0x57   : > { %563 = vmatprep.mubr.f32.mxu0 %v2043_v7  ;;  %1406 = vmatpush3.msra.mxu1 %v327_v8  ;;  %v817_v8 = vld [vmem:[%s2362_s4 + $0x50] sm:$0xff] }
  0x58   : > { %633 = vmatprep.mubr.f32.mxu1 %v2049_v9  ;;  %564 = vmatmul.mubr.f32.vlgmr.msra.gmra.mxu0 %v2052_v10 }
  0x59   : > { %634 = vmatmul.mubr.f32.vlgmr.msra.gmra.mxu1 %v2055_v11  ;;  %1421 = vmatprep.subr.mxu0 %v1552_v13 }
  0x5a   : > { %1440 = vmatprep.subr.mxu1 %v1552_v13  ;;  %1422 = vmatpush3.msra.mxu0 %v646_v12  ;;  %v808_v12 = vld [vmem:[%s2362_s4 + $0x8] sm:$0xff] }
  0x5b   : > { %1423 = vmatprep.subr.mxu0 %v1552_v13  ;;  %1437 = vmatprep.mubr.msk.f32.mxu0 %vm1553_vm0, %v1552_v13 }
  0x5c   : > { %1424 = vmatpush3.msra.mxu0 %v645_v14  ;;  %1442 = vmatprep.mubr.msk.f32.mxu1 %vm1553_vm0, %v1552_v13  ;;  %v810_v14 = vld [vmem:[%s2362_s4 + $0x18] sm:$0xff] }
  0x5d   : > { %1425 = vmatprep.subr.mxu0 %v1552_v13  ;;  %1441 = vmatpush3.msk.msra.mxu1 %vm727_vm1, %v722_v21 }
  0x5e   : > { %1426 = vmatpush3.msra.mxu0 %v644_v15  ;;  %890 = vmatprep.subr.mxu1 %v864_v40  ;;  %v807_v15 = vld [vmem:[%s2362_s4] sm:$0xff]  ;;  %v838_v40 = vld [vmem:[%s2362_s4 + $0xf8] sm:$0xff] }
  0x5f   : > { %1427 = vmatprep.subr.mxu0 %v1552_v13 }
  0x60   : > { %1428 = vmatpush3.msra.mxu0 %v643_v16  ;;  %v809_v16 = vld [vmem:[%s2362_s4 + $0x10] sm:$0xff] }
  0x61   : > { %1429 = vmatprep.subr.mxu0 %v1552_v13 }
  0x62   : > { %1430 = vmatpush3.msra.mxu0 %v642_v17  ;;  %v868_v17 = vld [vmem:[%s2362_s4 + $0x1e8] sm:$0xff] }
  0x63   : > { %1431 = vmatprep.subr.mxu0 %v1552_v13 }
  0x64   : > { %1432 = vmatpush3.msra.mxu0 %v641_v18  ;;  %v870_v18 = vld [vmem:[%s2362_s4 + $0x1f8] sm:$0xff] }
  0x65   : > { %1433 = vmatprep.subr.mxu0 %v1552_v13 }
  0x66   : > { %1434 = vmatpush3.msra.mxu0 %v640_v19 }
  0x67   : > { %1435 = vmatprep.subr.mxu0 %v1552_v13 }
  0x68   : > { %1436 = vmatpush3.msra.mxu0 %v639_v20 }
  0x69   : > { %961 = vmatprep.subr.mxu0 %v866_v41  ;;  %v835_v41 = vld [vmem:[%s2362_s4 + $0xe0] sm:$0xff] }
  0xf6   : > { %v1302_v22 = vpop.f32.mrf.mxu0 }
  0xf7   : > { %v1337_v23 = vpop.f32.mrf.mxu1 }
  0xf8   : > { %v1303_v24 = vpop.f32.mrf.mxu0 }
  0xf9   : > { %v1338_v25 = vpop.f32.mrf.mxu1  ;;  %v1304_v26 = vadd.f32 %v1303_v24, %v1302_v22  ;;  %v867_v24 = vld [vmem:[%s2362_s4 + $0x1e0] sm:$0xff] }
  0xfa   : > { %v1339_v27 = vadd.f32 %v1338_v25, %v1337_v23  ;;  %v869_v25 = vld [vmem:[%s2362_s4 + $0x1f0] sm:$0xff] }
  0xfc   : > { %v496_v32 = vadd.f32 %v1339_v27, %v1304_v26  ;;  %v860_v27 = vld [vmem:[%s2362_s4 + $0x1a8] sm:$0xff] }
 0x118   : > { %v1372_v28 = vpop.f32.mrf.mxu0 }
 0x119   : > { %v1407_v29 = vpop.f32.mrf.mxu1 }
 0x11a   : > { %v1373_v30 = vpop.f32.mrf.mxu0 }
 0x11b   : > { %v1408_v31 = vpop.f32.mrf.mxu1  ;;  %v1374_v33 = vadd.f32 %v1373_v30, %v1372_v28  ;;  %v862_v28 = vld [vmem:[%s2362_s4 + $0x1b8] sm:$0xff]  ;;  %v861_v30 = vld [vmem:[%s2362_s4 + $0x1b0] sm:$0xff] }
 0x11c   : > { %v1409_v35 = vadd.f32 %v1408_v31, %v1407_v29  ;;  %v859_v29 = vld [vmem:[%s2362_s4 + $0x1a0] sm:$0xff]  ;;  %v852_v31 = vld [vmem:[%s2362_s4 + $0x168] sm:$0xff] }
 0x11d   : > { %v566_v34 = vadd.f32 %v1374_v33, %v496_v32  ;;  %v854_v32 = vld [vmem:[%s2362_s4 + $0x178] sm:$0xff]  ;;  %v851_v33 = vld [vmem:[%s2362_s4 + $0x160] sm:$0xff] }
 0x11f   : > { %v636_v36 = vadd.f32 %v1409_v35, %v566_v34  ;;  %v853_v34 = vld [vmem:[%s2362_s4 + $0x170] sm:$0xff]  ;;  %v844_v35 = vld [vmem:[%s2362_s4 + $0x128] sm:$0xff] }
 0x121   : > { %1438 = vmatmul.mubr.msk.f32.vlgmr.msra.gmra.mxu0 %vm647_vm2, %v636_v36  ;;  %v846_v36 = vld [vmem:[%s2362_s4 + $0x138] sm:$0xff] }
 0x122   : > { %1009 = vmatprep.mubr.f32.mxu0 %v1552_v13  ;;  %962 = vmatpush1.msra.mxu0 %v865_v43  ;;  %v828_v43 = vld [vmem:[%s2362_s4 + $0xa8] sm:$0xff] }
 0x123   : > { %963 = vmatprep.subr.mxu0 %v858_v45  ;;  %v827_v45 = vld [vmem:[%s2362_s4 + $0xa0] sm:$0xff] }
 0x124   : > { %964 = vmatpush1.msra.mxu0 %v857_v47  ;;  %v820_v47 = vld [vmem:[%s2362_s4 + $0x68] sm:$0xff] }
 0x125   : > { %965 = vmatprep.subr.mxu0 %v850_v49  ;;  %v819_v49 = vld [vmem:[%s2362_s4 + $0x60] sm:$0xff] }
 0x126   : > { %966 = vmatpush1.msra.mxu0 %v849_v51  ;;  %v812_v51 = vld [vmem:[%s2362_s4 + $0x28] sm:$0xff] }
 0x127   : > { %967 = vmatprep.subr.mxu0 %v842_v53  ;;  %v811_v53 = vld [vmem:[%s2362_s4 + $0x20] sm:$0xff] }
 0x128   : > { %968 = vmatpush1.msra.mxu0 %v841_v55 }
 0x129   : > { %969 = vmatprep.subr.mxu0 %v834_v57 }
 0x12a   : > { %970 = vmatpush1.msra.mxu0 %v833_v59 }
 0x12b   : > { %971 = vmatprep.subr.mxu0 %v826_v61 }
 0x12c   : > { %972 = vmatpush1.msra.mxu0 %v825_v0 }
 0x12d   : > { %973 = vmatprep.subr.mxu0 %v818_v5 }
 0x12e   : > { %974 = vmatpush1.msra.mxu0 %v817_v8 }
 0x12f   : > { %975 = vmatprep.subr.mxu0 %v810_v14 }
 0x130   : > { %976 = vmatpush1.msra.mxu0 %v809_v16 }
 0x131   : > { %1103 = vmatprep.subr.mxu0 %v870_v18 }
 0x1e1   : > { %v717_v37 = vpop.f32.mrf.mxu0 }
 0x1e2   : > { %v721_v38 = vmax.f32 %v717_v37, 0.0  ;;  %v843_v37 = vld [vmem:[%s2362_s4 + $0x120] sm:$0xff] }
 0x1e3   : > { %v1439_v39 = vpop.f32.mrf.mxu0 }
 0x1e4   : > { %1443 = vmatmul.mubr.msk.f32.vlgmr.msra.gmra.mxu1 %vm723_vm3, %v721_v38  ;;  %v845_v38 = vld [vmem:[%s2362_s4 + $0x130] sm:$0xff]  ;;  %v836_v39 = vld [vmem:[%s2362_s4 + $0xe8] sm:$0xff] }
 0x1e5   : > { %938 = vmatprep.mubr.f32.mxu1 %v1552_v13  ;;  %891 = vmatpush1.msra.mxu1 %v863_v42  ;;  %v837_v42 = vld [vmem:[%s2362_s4 + $0xf0] sm:$0xff] }
 0x1e6   : > { %892 = vmatprep.subr.mxu1 %v856_v44  ;;  %v830_v44 = vld [vmem:[%s2362_s4 + $0xb8] sm:$0xff] }
 0x1e7   : > { %893 = vmatpush1.msra.mxu1 %v855_v46  ;;  %v829_v46 = vld [vmem:[%s2362_s4 + $0xb0] sm:$0xff] }
 0x1e8   : > { %894 = vmatprep.subr.mxu1 %v848_v48  ;;  %v822_v48 = vld [vmem:[%s2362_s4 + $0x78] sm:$0xff] }
 0x1e9   : > { %895 = vmatpush1.msra.mxu1 %v847_v50  ;;  %v821_v50 = vld [vmem:[%s2362_s4 + $0x70] sm:$0xff] }
 0x1ea   : > { %896 = vmatprep.subr.mxu1 %v840_v52  ;;  %v814_v52 = vld [vmem:[%s2362_s4 + $0x38] sm:$0xff] }
 0x1eb   : > { %897 = vmatpush1.msra.mxu1 %v839_v54  ;;  %v813_v54 = vld [vmem:[%s2362_s4 + $0x30] sm:$0xff] }
 0x1ec   : > { %898 = vmatprep.subr.mxu1 %v832_v56 }
 0x1ed   : > { %899 = vmatpush1.msra.mxu1 %v831_v58 }
 0x1ee   : > { %900 = vmatprep.subr.mxu1 %v824_v60 }
 0x1ef   : > { %901 = vmatpush1.msra.mxu1 %v823_v62 }
 0x1f0   : > { %902 = vmatprep.subr.mxu1 %v816_v4 }
 0x1f1   : > { %903 = vmatpush1.msra.mxu1 %v815_v6 }
 0x1f2   : > { %904 = vmatprep.subr.mxu1 %v808_v12 }
 0x1f3   : > { %905 = vmatpush1.msra.mxu1 %v807_v15 }
 0x1f4   : > { %1032 = vmatprep.subr.mxu1 %v868_v17 }
 0x2a4   : > { %v797_v19 = vpop.f32.mrf.mxu1 }
 0x2a5   : > { %v1258_v20 = vmul.f32 -1.442695, %v797_v19 }
 0x2a6   : > { %v1444_v21 = vpop.f32.mrf.mxu1 }
 0x2a7   : > { %1486 = vpow2.f32 %v1258_v20 }
 0x2b4   : > { %v1487_v22 = vpop.eup %1486 }
 0x2b5   : > { %v804_v23 = vadd.f32 1.0, %v1487_v22 }
 0x2b7   : > { %1488 = vrcp.f32 %v804_v23 }
 0x2c4   : > { %v2210_v26 = vpop.eup %1488 }
 0x2c5   : > { %1259 = vmatmul.mubr.msk.f32.vlgmr.msra.gmra.mxu1 %vm647_vm2, %v2210_v26  ;;  %1260 = vmatmul.mubr.msk.f32.vlgmr.msra.gmra.mxu0 %vm647_vm2, %v2210_v26 }
 0x2c6   : > { %1033 = vmatpush1.msra.mxu1 %v867_v24  ;;  %1104 = vmatpush1.msra.mxu0 %v869_v25 }
 0x2c7   : > { %1034 = vmatprep.subr.mxu1 %v860_v27  ;;  %1105 = vmatprep.subr.mxu0 %v862_v28 }
 0x2c8   : > { %1035 = vmatpush1.msra.mxu1 %v859_v29  ;;  %1106 = vmatpush1.msra.mxu0 %v861_v30 }
 0x2c9   : > { %1036 = vmatprep.subr.mxu1 %v852_v31  ;;  %1107 = vmatprep.subr.mxu0 %v854_v32 }
 0x2ca   : > { %1037 = vmatpush1.msra.mxu1 %v851_v33  ;;  %1108 = vmatpush1.msra.mxu0 %v853_v34 }
 0x2cb   : > { %1038 = vmatprep.subr.mxu1 %v844_v35  ;;  %1109 = vmatprep.subr.mxu0 %v846_v36 }
 0x2cc   : > { %1039 = vmatpush1.msra.mxu1 %v843_v37  ;;  %1110 = vmatpush1.msra.mxu0 %v845_v38 }
 0x2cd   : > { %1040 = vmatprep.subr.mxu1 %v836_v39  ;;  %1111 = vmatprep.subr.mxu0 %v838_v40 }
 0x2ce   : > { %1041 = vmatpush1.msra.mxu1 %v835_v41  ;;  %1112 = vmatpush1.msra.mxu0 %v837_v42 }
 0x2cf   : > { %1042 = vmatprep.subr.mxu1 %v828_v43  ;;  %1113 = vmatprep.subr.mxu0 %v830_v44 }
 0x2d0   : > { %1043 = vmatpush1.msra.mxu1 %v827_v45  ;;  %1114 = vmatpush1.msra.mxu0 %v829_v46 }
 0x2d1   : > { %1044 = vmatprep.subr.mxu1 %v820_v47  ;;  %1115 = vmatprep.subr.mxu0 %v822_v48 }
 0x2d2   : > { %1045 = vmatpush1.msra.mxu1 %v819_v49  ;;  %1116 = vmatpush1.msra.mxu0 %v821_v50 }
 0x2d3   : > { %1046 = vmatprep.subr.mxu1 %v812_v51  ;;  %1117 = vmatprep.subr.mxu0 %v814_v52 }
 0x2d4   : > { %1047 = vmatpush1.msra.mxu1 %v811_v53  ;;  %1080 = vmatprep.mubr.f32.mxu1 %v1552_v13 }
 0x2d5   : > { %1118 = vmatpush1.msra.mxu0 %v813_v54  ;;  %1151 = vmatprep.mubr.f32.mxu0 %v1552_v13 }
 0x2d6   : > { %1261 = vmatmul.mubr.msk.f32.vlgmr.msra.gmra.mxu1 %vm647_vm2, %v2210_v26  ;;  %1262 = vmatmul.mubr.msk.f32.vlgmr.msra.gmra.mxu0 %vm647_vm2, %v2210_v26 }
 0x385   : > { %v940_v55 = vpop.f32.mrf.mxu1  ;;  %v1011_v56 = vpop.f32.mrf.mxu0 }
 0x386   : > { %v1158_v57 = vmul.f32 %v940_v55, %v1844_v2  ;;  %v1160_v58 = vmul.f32 %v1011_v56, %v1847_v3 }
 0x387   : > { %v942_v59 = vpop.f32.mrf.mxu1  ;;  %v1013_v60 = vpop.f32.mrf.mxu0 }
 0x388   : > { %1166 = vst [vmem:[%s217_s7] sm:$0xff] %v1158_v57  ;;  %1168 = vst [vmem:[%s217_s7 + $0x10] sm:$0xff] %v1160_v58  ;;  %v1159_v13 = vmul.f32 %v942_v59, %v1835_v63  ;;  %v1161_v61 = vmul.f32 %v1013_v60, %v1841_v1 }
 0x38a   : > { %1167 = vst [vmem:[%s217_s7 + $0x8] sm:$0xff] %v1159_v13  ;;  %1169 = vst [vmem:[%s217_s7 + $0x18] sm:$0xff] %v1161_v61 }
 0x396   : > { %v1082_v62 = vpop.f32.mrf.mxu1  ;;  %v1153_v0 = vpop.f32.mrf.mxu0 }
 0x397   : > { %v1162_v2 = vmul.f32 %v1082_v62, %v2052_v10  ;;  %v1164_v3 = vmul.f32 %v1153_v0, %v2055_v11 }
 0x398   : > { %v1084_v4 = vpop.f32.mrf.mxu1  ;;  %v1155_v5 = vpop.f32.mrf.mxu0 }
 0x399   : > { %1170 = vst [vmem:[%s217_s7 + $0x20] sm:$0xff] %v1162_v2  ;;  %1172 = vst [vmem:[%s217_s7 + $0x30] sm:$0xff] %v1164_v3  ;;  %v1163_v63 = vmul.f32 %v1084_v4, %v2043_v7  ;;  %v1165_v1 = vmul.f32 %v1155_v5, %v2049_v9 }
 0x39b   : > { %1171 = vst [vmem:[%s217_s7 + $0x28] sm:$0xff] %v1163_v63  ;;  %1173 = vst [vmem:[%s217_s7 + $0x38] sm:$0xff] %v1165_v1 }
 0x39c   : > { %1503 = shalt.err (!%p1500_p3)
}
 0x39d   : > { %s1504_s25 = scalar_lea.hbm %s2321_s11, 1024  ;;  %s1508_s15 = scalar_lea.hbm %s2363_s5, 2048 }
 0x39e   : > { %p1505_p4 = scmp.ne.s32.totalorder %s2321_s11, %s1504_s25  ;;  %p1509_p9 = scmp.lt.s32.totalorder %s2321_s11, %s2363_s5 }
 0x39f   : > { %p1510_p10 = scmp.lt.s32.totalorder %s1508_s15, %s1504_s25 }
 0x3a0   : > { %p1506_p7 = pnand %p1505_p4, %p1623_p5 }
 0x3a1   : > { %p1511_p11 = por %p1510_p10, %p1509_p9 }
 0x3a2   : > { %p1507_p8 = pneg %p1506_p7 }
 0x3a4   : > { %p1512_p12 = pnand %p1511_p11, %p1507_p8 }
 0x3a6   : > { %1515 = shalt.err (!%p1512_p12)
}
 0x3a7   : > { %1445 = dma.vmem_to_hbm [thread:$0]  (%p1623_p5), %s1190_s8, 1024, %s2321_s11, %s1175_s22  }
 0x3a8 PF: > { %p1451_p13 = scmp.ge.s32.totalorder %s1550_s21, 2  ;;  %s1201_s7 = sand.u32 1, %s1538_s18  }
 0x3a9   : > { %s1202_s13 = scalar_lea.sflag [#allocation3], %s1201_s7 }
 0x3aa   : > { %p1448_p0 = pnand %p1451_p13, %p1627_p6 }
 0x3ac   : > { %p1449_p1 = pneg %p1448_p0 }
 0x3ae   : > { %1533 = dma.done.wait (%p1449_p1), %s1202_s13, 1024  }
 0x3af   : > { %1535 = vsyncadd (%p1449_p1), %s1202_s13, 4294966272  ;;  %p15_p2 = scmp.ge.s32.totalorder %s1610_s24, 4   ;;  %s2366_s18 = smov %s1542_s19 }
 0x3b0   : > { %s2367_s19 = smov %s1546_s20  ;;  %s2368_s20 = smov %s1621_s27 }
 0x3b1   : > { %s2369_s21 = smov %s1610_s24  ;;  %17 = sbr.rel (!%p15_p2) target bundleno = 3 (0x3), region = 75 }
 0x3b6   :  { %1207 = vsyncpa [#allocation3], 1 }
 0x3b7   :  { %1209 = vsyncpa [#allocation3 + $0x1], 1 }

</bundles_post_ra>
